<compile_context>
chip_gen: v6e
topology: v6e:2x2x1
jax: 0.10.0
libtpu: 0.0.40
codegen_flags: <defaults>
</compile_context>

<pallas_src>
import math

import jax
import jax.numpy as jnp
from jax.experimental import pallas as pl
from jax.experimental.pallas import tpu as pltpu


def _round_up(x, m):
    return ((x + m - 1) // m) * m


def _synapse_kernel(e_ref, conn_ref, mask_ref, out_ref):
    # e_ref:    (t_block, 1)        neurotransmitter column tile (lane-broadcast)
    # conn_ref: (t_block, p_block)  connectivity tile
    # mask_ref: (1, p_block)        dendrite-population mask tile (sublane-broadcast)
    # out_ref:  (t_block, p_block)
    out_ref[...] = e_ref[...] * conn_ref[...] * mask_ref[...]


def _outer_kernel(e_ref, mask_ref, out_ref):
    # Fast path for all-ones connectivity (dense_connectivity()): out = e ⊗ mask,
    # halving HBM traffic by skipping the connectivity read stream.
    out_ref[...] = e_ref[...] * mask_ref[...]


def simple_synapse_forward(e, connectivity, mask, terminal_shape, population_shape,
                           *, connectivity_is_all_ones=False,
                           t_block_max=512, p_block_max=2048):
    """Computes the tensor handed to dendrite.forward().

    e:            shape terminal_shape                   (axon.neurotransmitters())
    connectivity: shape (*terminal, *population)         (ignored on the all-ones fast path)
    mask:         scalar or population_shape             (torch default: scalar True)
    returns:      float32, shape (*terminal_shape, *population_shape)
    """
    T = math.prod(terminal_shape)
    P = math.prod(population_shape)

    e2 = jnp.asarray(e, jnp.float32).reshape(T, 1)
    mask2 = jnp.broadcast_to(jnp.asarray(mask, jnp.float32),
                             population_shape).reshape(1, P)

    # ---- tile selection ------------------------------------------------------
    # p_block: lane-dense multiple of 128 so output stores stay unmasked vst.
    p_block = min(_round_up(P, 128), p_block_max)
    # t_block: multiple of 8, as large as possible while keeping the
    # double-buffered conn+out tiles (2 arrays x 2 buffers) under ~16 MiB.
    tile_budget_bytes = 16 * 1024 * 1024
    max_rows = max(8, (tile_budget_bytes // (4 * p_block * 4)) // 8 * 8)
    t_block = max(8, min(_round_up(T, 8), t_block_max, max_rows))

    grid = (pl.cdiv(T, t_block), pl.cdiv(P, p_block))

    # Raise scoped VMEM enough for the tiles (v5e default is only 16 MiB), but
    # stay well under v7x's 64 MiB physical per-core VMEM.
    vmem_need = (4 * t_block * p_block + 2 * t_block * 128 + 2 * 8 * p_block) * 4
    vmem_limit = int(min(max(vmem_need + (8 << 20), 24 << 20), 40 << 20))

    compiler_params = pltpu.CompilerParams(
        dimension_semantics=("parallel", "parallel"),   # shard across both TCs on v7x
        vmem_limit_bytes=vmem_limit,
    )

    e_spec = pl.BlockSpec((t_block, 1), lambda i, j: (i, 0))
    mask_spec = pl.BlockSpec((1, p_block), lambda i, j: (0, j))
    tile_spec = pl.BlockSpec((t_block, p_block), lambda i, j: (i, j))

    out_shape = jax.ShapeDtypeStruct((T, P), jnp.float32)

    if connectivity_is_all_ones:
        cost = pl.CostEstimate(flops=T * P, transcendentals=0,
                               bytes_accessed=4 * (T * P + T + P))
        out2 = pl.pallas_call(
            _outer_kernel,
            out_shape=out_shape,
            grid_spec=pltpu.PrefetchScalarGridSpec(
                num_scalar_prefetch=0,
                grid=grid,
                in_specs=[e_spec, mask_spec],
                out_specs=tile_spec,
            ),
            compiler_params=compiler_params,
            cost_estimate=cost,
        )(e2, mask2)
    else:
        conn2 = jnp.asarray(connectivity, jnp.float32).reshape(T, P)
        cost = pl.CostEstimate(flops=2 * T * P, transcendentals=0,
                               bytes_accessed=4 * (2 * T * P + T + P))
        out2 = pl.pallas_call(
            _synapse_kernel,
            out_shape=out_shape,
            grid_spec=pltpu.PrefetchScalarGridSpec(
                num_scalar_prefetch=0,
                grid=grid,
                in_specs=[e_spec, tile_spec, mask_spec],
                out_specs=tile_spec,
            ),
            compiler_params=compiler_params,
            cost_estimate=cost,
        )(e2, conn2, mask2)

    return out2.reshape(*terminal_shape, *population_shape)


if __name__ == "__main__":
    # Small shapes consistent with the module:
    #   axon.shape == dendrite.terminal_shape == (4, 16)
    #   dendrite.population_shape == (2, 64)
    #   connectivity.shape == dendrite.shape == (4, 16, 2, 64)
    terminal_shape = (4, 16)
    population_shape = (2, 64)

    key = jax.random.PRNGKey(0)
    k_e, k_conn, k_mask = jax.random.split(key, 3)

    # axon.neurotransmitters() -> synthetic deterministic activations
    e = jax.random.uniform(k_e, terminal_shape, dtype=jnp.float32)

    # Non-trivial connectivity exercises the general kernel path.
    connectivity = jax.random.uniform(
        k_conn, (*terminal_shape, *population_shape), dtype=jnp.float32)

    # Population-shaped boolean mask exercises the broadcast path.
    mask = (jax.random.uniform(k_mask, population_shape) > 0.3).astype(jnp.float32)

    # General path: arbitrary connectivity, population-shaped mask.
    out = simple_synapse_forward(e, connectivity, mask,
                                 terminal_shape, population_shape)
    out = jax.block_until_ready(out)

    e_b = e.reshape(*terminal_shape, *[1] * len(population_shape))
    ref = e_b * connectivity * mask
    assert out.shape == (*terminal_shape, *population_shape)
    assert jnp.allclose(out, ref, atol=1e-6), "general path mismatch vs reference"

    # Fast path: dense_connectivity() == all-ones, default mask == scalar True.
    out_fast = simple_synapse_forward(e, None, True,
                                      terminal_shape, population_shape,
                                      connectivity_is_all_ones=True)
    out_fast = jax.block_until_ready(out_fast)
    ref_fast = jnp.broadcast_to(e_b, (*terminal_shape, *population_shape))
    assert jnp.allclose(out_fast, ref_fast, atol=1e-6), "fast path mismatch vs reference"

    # TODO(synk): dendrite.forward(e) / dendrite state update lives in
    # AbstractDendriteSet (not provided); the kernel returns the tensor handed to it.
    print("KERNEL_OK")
</pallas_src>

<mosaic_0001>
module attributes {stable_mosaic.version = 11 : i64} {
  func.func @_synapse_kernel(%arg0: i32, %arg1: i32, %arg2: memref<64x1xf32, #tpu.memory_space<vmem>>, %arg3: memref<64x128xf32, #tpu.memory_space<vmem>>, %arg4: memref<1x128xf32, #tpu.memory_space<vmem>>, %arg5: memref<64x128xf32, #tpu.memory_space<vmem>>) attributes {dimension_semantics = [#tpu.dimension_semantics<parallel>, #tpu.dimension_semantics<parallel>], iteration_bounds = array<i64: 1, 1>, scalar_prefetch = 0 : i64, scratch_operands = 0 : i64, tpu.core_type = #tpu.core_type<tc>, window_params = [{transform_indices = @transform_0, window_bounds = array<i64: 64, 1>}, {transform_indices = @transform_1, window_bounds = array<i64: 64, 128>}, {transform_indices = @transform_2, window_bounds = array<i64: 1, 128>}, {transform_indices = @transform_3, window_bounds = array<i64: 64, 128>}]} {
    %c0 = arith.constant 0 : index
    %c0_0 = arith.constant 0 : index
    %0 = vector.load %arg2[%c0, %c0_0] : memref<64x1xf32, #tpu.memory_space<vmem>>, vector<64x1xf32>
    %c0_1 = arith.constant 0 : index
    %c0_2 = arith.constant 0 : index
    %1 = vector.load %arg3[%c0_1, %c0_2] : memref<64x128xf32, #tpu.memory_space<vmem>>, vector<64x128xf32>
    %2 = vector.broadcast %0 : vector<64x1xf32> to vector<64x128xf32>
    %3 = arith.mulf %2, %1 : vector<64x128xf32>
    %c0_3 = arith.constant 0 : index
    %c0_4 = arith.constant 0 : index
    %4 = vector.load %arg4[%c0_3, %c0_4] : memref<1x128xf32, #tpu.memory_space<vmem>>, vector<1x128xf32>
    %5 = vector.broadcast %4 : vector<1x128xf32> to vector<64x128xf32>
    %6 = arith.mulf %3, %5 : vector<64x128xf32>
    %c0_5 = arith.constant 0 : index
    %c0_6 = arith.constant 0 : index
    %7 = vector.load %arg5[%c0_5, %c0_6] : memref<64x128xf32, #tpu.memory_space<vmem>>, vector<64x128xf32>
    tpu.vector_store %arg5[%c0_5, %c0_6], %6 {strides = array<i32>} : memref<64x128xf32, #tpu.memory_space<vmem>>, vector<64x128xf32>,
    return
  }
  func.func @transform_0(%arg0: i32, %arg1: i32) -> (i32, i32) {
    %c0_i32 = arith.constant 0 : i32
    %c0_i32_0 = arith.constant 0 : i32
    return %arg0, %c0_i32 : i32, i32
  }
  func.func @transform_1(%arg0: i32, %arg1: i32) -> (i32, i32) {
    %c0_i32 = arith.constant 0 : i32
    return %arg0, %arg1 : i32, i32
  }
  func.func @transform_2(%arg0: i32, %arg1: i32) -> (i32, i32) {
    %c0_i32 = arith.constant 0 : i32
    %c0_i32_0 = arith.constant 0 : i32
    return %c0_i32, %arg1 : i32, i32
  }
  func.func @transform_3(%arg0: i32, %arg1: i32) -> (i32, i32) {
    %c0_i32 = arith.constant 0 : i32
    return %arg0, %arg1 : i32, i32
  }
}

</mosaic_0001>

<bundles_post_ra>
// kernel: tpu_custom_call.1
= control target key start
LH: loop header
LB: loop body
LE: loop exit
PB: predicated region body
PF: predicated region fallthrough
CT: control target
= control target key end

     0   :  { %v147_v2 = vmov 0   ;;  %s225_s0 = inlined_call_operand.vmem [shape: f32[64,1], index: 0, kind: input, shape index: {}]   ;;  %s226_s1 = inlined_call_operand.vmem [shape: f32[64,128], index: 1, kind: input, shape index: {}]   ;;  %s227_s2 = inlined_call_operand.vmem [shape: f32[1,128], index: 2, kind: input, shape index: {}]   ;;  %s228_s3 = inlined_call_operand.hbm [shape: f32[64,128], index: 3, kind: output, shape index: {}]  }
   0x1   :  { %v17_v0 = vld [vmem:[%s225_s0 + $0x10] sm:$0xff]  ;;  %v15_v1 = vld [vmem:[%s225_s0] sm:$0xff]  ;;  %124 = vset.pattern.permute.xlu1 %v147_v2  ;;  %123 = vset.pattern.permute.xlu0 %v147_v2  ;;  %v18_v3 = vld [vmem:[%s225_s0 + $0x18] sm:$0xff] }
   0x2   :  { %43 = vperm.xlu1 %124, %v17_v0   ;;  %33 = vperm.xlu0 %123, %v15_v1   ;;  %v16_v4 = vld [vmem:[%s225_s0 + $0x8] sm:$0xff] }
   0x3   :  { %8 = vsyncpa [#allocation3], 0  ;;  %v20_v5 = vld [vmem:[%s225_s0 + $0x28] sm:$0xff]  ;;  %v19_v6 = vld [vmem:[%s225_s0 + $0x20] sm:$0xff]  ;;  %s148_s17 = smov [#allocation2]  }
   0x4   :  { %v22_v7 = vld [vmem:[%s225_s0 + $0x38] sm:$0xff]  ;;  %v21_v8 = vld [vmem:[%s225_s0 + $0x30] sm:$0xff]  ;;  %v23_v10 = vld [vmem:[%s226_s1] sm:$0xff]  ;;  %s107_s18 = sshll.u32 %s148_s17, 4  ;;  %s108_s18 = int_to_ptr.vmem [resolvable:$true] %s107_s18 }
   0x5   :  { %v25_v9 = vld [vmem:[%s226_s1 + $0x10] sm:$0xff]  ;;  %v118_v11 = vld [vmem:[%s227_s2] ss:$0 sm:$0xff]  ;;  %v26_v16 = vld [vmem:[%s226_s1 + $0x18] sm:$0xff]  ;;  %s125_s19 = scalar_lea.vmem %s108_s18, 1024  ;;  %p130_p1 = scmp.lt.s32.totalorder %s108_s18, %s108_s18 }
   0x6   :  { %48 = vperm.xlu1 %124, %v18_v3   ;;  %38 = vperm.xlu0 %123, %v16_v4   ;;  %v24_v17 = vld [vmem:[%s226_s1 + $0x8] sm:$0xff]  ;;  %v27_v25 = vld [vmem:[%s226_s1 + $0x20] sm:$0xff]  ;;  %v30_v32 = vld [vmem:[%s226_s1 + $0x38] sm:$0xff]  ;;  %p126_p0 = scmp.ne.s32.totalorder %s108_s18, %s125_s19  ;;  %p131_p2 = scmp.lt.s32.totalorder %s125_s19, %s125_s19 }
   0x7   :  { %v28_v24 = vld [vmem:[%s226_s1 + $0x28] sm:$0xff]  ;;  %v29_v33 = vld [vmem:[%s226_s1 + $0x30] sm:$0xff] }
   0x8   :  { %p132_p3 = por %p131_p2, %p130_p1 }
   0xa   :  { %58 = vperm.xlu1 %124, %v20_v5   ;;  %53 = vperm.xlu0 %123, %v19_v6   ;;  %p133_p4 = pnand %p132_p3, %p126_p0 }
   0xe   :  { %68 = vperm.xlu1 %124, %v22_v7   ;;  %63 = vperm.xlu0 %123, %v21_v8  }
  0x7d   :  { %v44_v12 = vpop.permute.xlu1 %43  ;;  %v34_v13 = vpop.permute.xlu0 %33 }
  0x7e   :  { %v73_v14 = vmul.f32 %v44_v12, %v25_v9  ;;  %v71_v15 = vmul.f32 %v34_v13, %v23_v10 }
  0x80   :  { %v88_v18 = vmul.f32 %v118_v11, %v73_v14  ;;  %v86_v19 = vmul.f32 %v118_v11, %v71_v15 }
  0x81   :  { %v49_v20 = vpop.permute.xlu1 %48  ;;  %v39_v21 = vpop.permute.xlu0 %38 }
  0x82   :  { %96 = vst [vmem:[#allocation2 + $0x10] sm:$0xff] %v88_v18  ;;  %94 = vst [vmem:[#allocation2] sm:$0xff] %v86_v19  ;;  %v74_v22 = vmul.f32 %v49_v20, %v26_v16  ;;  %v72_v23 = vmul.f32 %v39_v21, %v24_v17 }
  0x84   :  { %v89_v26 = vmul.f32 %v118_v11, %v74_v22  ;;  %v87_v27 = vmul.f32 %v118_v11, %v72_v23 }
  0x85   :  { %v59_v28 = vpop.permute.xlu1 %58  ;;  %v54_v29 = vpop.permute.xlu0 %53 }
  0x86   :  { %97 = vst [vmem:[#allocation2 + $0x18] sm:$0xff] %v89_v26  ;;  %95 = vst [vmem:[#allocation2 + $0x8] sm:$0xff] %v87_v27  ;;  %v76_v30 = vmul.f32 %v59_v28, %v28_v24  ;;  %v75_v31 = vmul.f32 %v54_v29, %v27_v25 }
  0x88   :  { %v91_v34 = vmul.f32 %v118_v11, %v76_v30  ;;  %v90_v35 = vmul.f32 %v118_v11, %v75_v31 }
  0x89   :  { %v69_v36 = vpop.permute.xlu1 %68  ;;  %v64_v37 = vpop.permute.xlu0 %63 }
  0x8a   :  { %99 = vst [vmem:[#allocation2 + $0x28] sm:$0xff] %v91_v34  ;;  %98 = vst [vmem:[#allocation2 + $0x20] sm:$0xff] %v90_v35  ;;  %v78_v38 = vmul.f32 %v69_v36, %v30_v32  ;;  %v77_v39 = vmul.f32 %v64_v37, %v29_v33 }
  0x8c   :  { %v93_v40 = vmul.f32 %v118_v11, %v78_v38  ;;  %v92_v41 = vmul.f32 %v118_v11, %v77_v39 }
  0x8e   :  { %101 = vst [vmem:[#allocation2 + $0x38] sm:$0xff] %v93_v40  ;;  %100 = vst [vmem:[#allocation2 + $0x30] sm:$0xff] %v92_v41 }
  0x8f   :  { %136 = shalt.err (!%p133_p4)
}
  0x90   :  { %s149_s1 = smov 128   ;;  %s150_s20 = smov 8  }
  0x91   :  { %113 = dma.vmem_to_hbm [thread:$0]  %s108_s18, 1024, %s228_s3, [#allocation3], %s149_s1, %s149_s1, %s150_s20  }
  0x92   :  { %145 = dma.done.wait [#allocation3], 1024  }
  0x93   :  { %146 = vsyncadd [#allocation3], 4294966272 }
  0x94   :  { %117 = vsyncpa [#allocation3], 1 }

</bundles_post_ra>
